<compile_context>
chip_gen: v5e
topology: v5e:2x2
jax: 0.10.0
libtpu: 0.0.40
codegen_flags: <defaults>
</compile_context>

<pallas_src>
import math
import functools

import numpy as np
import jax
import jax.numpy as jnp
from jax.experimental import pallas as pl
from jax.experimental.pallas import tpu as pltpu


# ---------------------------------------------------------------------------
# Kernel 1: AssociatedAttention + residual + LayerNorm
# ---------------------------------------------------------------------------
def attn_ln_kernel(xq_ref, xkv_ref, wq_ref, bq_ref, wk_ref, bk_ref, wv_ref, bv_ref,
                   wo_ref, bo_ref, gamma_ref, beta_ref, o_ref,
                   *, heads: int, pad_dk: int, eps: float):
    xq = xq_ref[0]           # (tq, D) f32 — query rows (also residual / LayerNorm rows)
    xkv = xkv_ref[0]         # (S,  D) f32 — all rows (keys / values)
    tq, D = xq.shape
    S = xkv.shape[0]

    # bf16 operands for every MXU matmul, f32 accumulation.
    xq_b = jnp.broadcast_to(xq.astype(jnp.bfloat16), (heads, tq, D))
    xkv_b = jnp.broadcast_to(xkv.astype(jnp.bfloat16), (heads, S, D))

    # Head-batched projections (single dot_general with a batch dim per tensor).
    # The per-head index_select and the 1/sqrt(d_k) scale are pre-folded into the weights.
    q = jnp.einsum("hsd,hdp->hsp", xq_b, wq_ref[...],
                   preferred_element_type=jnp.float32) + bq_ref[...]     # (H, tq, P)
    k = jnp.einsum("hsd,hdp->hsp", xkv_b, wk_ref[...],
                   preferred_element_type=jnp.float32) + bk_ref[...]     # (H, S, P)
    v = jnp.einsum("hsd,hdp->hsp", xkv_b, wv_ref[...],
                   preferred_element_type=jnp.float32) + bv_ref[...]     # (H, S, P)

    # Scores: contract the last dims of q and k directly (no explicit K transpose).
    s = jnp.einsum("hqp,hkp->hqk", q.astype(jnp.bfloat16), k.astype(jnp.bfloat16),
                   preferred_element_type=jnp.float32)                   # (H, tq, S)
    s = s - jnp.max(s, axis=-1, keepdims=True)
    p = jnp.exp(s)
    p = p * pl.reciprocal(jnp.sum(p, axis=-1, keepdims=True), approx=True)

    o_h = jnp.einsum("hqk,hkp->hqp", p.astype(jnp.bfloat16), v.astype(jnp.bfloat16),
                     preferred_element_type=jnp.float32)                 # (H, tq, P)

    # Output projection folded per head (padded rows are zero), reduced over heads.
    attn = jnp.sum(
        jnp.einsum("hqp,hpd->hqd", o_h.astype(jnp.bfloat16), wo_ref[...],
                   preferred_element_type=jnp.float32),
        axis=0) + bo_ref[...]                                            # (tq, D)

    # Dropout (eval) = identity; residual + LayerNorm in f32.
    y = xq + attn
    mu = jnp.mean(y, axis=-1, keepdims=True)
    yc = y - mu
    var = jnp.mean(yc * yc, axis=-1, keepdims=True)
    o_ref[0] = yc * jax.lax.rsqrt(var + eps) * gamma_ref[...] + beta_ref[...]


def attn_layernorm(x, ap, *, heads: int, pad_dk: int, eps: float = 1e-5, q_tile: int = 128):
    B, S, D = x.shape
    tq = min(q_tile, S)
    nq = pl.cdiv(S, tq)
    c2 = lambda b, qi: (0, 0)
    c3 = lambda b, qi: (0, 0, 0)
    kernel = functools.partial(attn_ln_kernel, heads=heads, pad_dk=pad_dk, eps=eps)
    return pl.pallas_call(
        kernel,
        out_shape=jax.ShapeDtypeStruct((B, S, D), jnp.float32),
        grid_spec=pltpu.PrefetchScalarGridSpec(
            num_scalar_prefetch=0,
            grid=(B, nq),
            in_specs=[
                pl.BlockSpec((1, tq, D), lambda b, qi: (b, qi, 0)),   # x: query / residual rows
                pl.BlockSpec((1, S, D), lambda b, qi: (b, 0, 0)),     # x: all rows for K / V
                pl.BlockSpec(ap["wq"].shape, c3), pl.BlockSpec(ap["bq"].shape, c3),
                pl.BlockSpec(ap["wk"].shape, c3), pl.BlockSpec(ap["bk"].shape, c3),
                pl.BlockSpec(ap["wv"].shape, c3), pl.BlockSpec(ap["bv"].shape, c3),
                pl.BlockSpec(ap["wo"].shape, c3), pl.BlockSpec(ap["bo"].shape, c2),
                pl.BlockSpec(ap["gamma"].shape, c2), pl.BlockSpec(ap["beta"].shape, c2),
            ],
            out_specs=pl.BlockSpec((1, tq, D), lambda b, qi: (b, qi, 0)),
        ),
        compiler_params=pltpu.CompilerParams(
            dimension_semantics=("parallel", "parallel"),
            vmem_limit_bytes=32 * 1024 * 1024),
    )(x, x,
      ap["wq"], ap["bq"], ap["wk"], ap["bk"], ap["wv"], ap["bv"],
      ap["wo"], ap["bo"], ap["gamma"], ap["beta"])


# ---------------------------------------------------------------------------
# Kernel 2: bidirectional multi-layer LSTM, returning out[:, -1]
# ---------------------------------------------------------------------------
def _sigmoid(z):
    # tanh-based sigmoid (numerically stable, lowers to the EUP).
    return 0.5 * (jnp.tanh(0.5 * z) + 1.0)


def lstm_kernel(*refs, n_layers: int, hidden: int, seq: int):
    H, S = hidden, seq
    x_ref = refs[0]
    w_refs = refs[1:1 + 6 * n_layers]             # per (layer, dir): wih, whh, bias
    o_ref = refs[1 + 6 * n_layers]
    xg_ref = refs[2 + 6 * n_layers]               # (S, 4H) scratch: precomputed input gates
    fwd_bufs = [refs[3 + 6 * n_layers], refs[4 + 6 * n_layers]]   # (S, H) ping-pong
    bwd_bufs = [refs[5 + 6 * n_layers], refs[6 + 6 * n_layers]]   # (S, H) ping-pong

    def run_direction(whh_ref, dst_ref, reverse):
        whh = whh_ref[...]                        # (H, 4H), hoisted out of the time loop

        def step(it, carry):
            h, c = carry
            t = (S - 1 - it) if reverse else it
            g = xg_ref[pl.ds(t, 1), :] + jnp.dot(h, whh, preferred_element_type=jnp.float32)
            i_g = _sigmoid(g[:, 0:H])
            f_g = _sigmoid(g[:, H:2 * H])
            c_g = jnp.tanh(g[:, 2 * H:3 * H])
            o_g = _sigmoid(g[:, 3 * H:4 * H])
            c = f_g * c + i_g * c_g
            h = o_g * jnp.tanh(c)
            dst_ref[pl.ds(t, 1), :] = h
            return (h, c)

        zeros = jnp.zeros((1, H), jnp.float32)
        jax.lax.fori_loop(0, S, step, (zeros, zeros), unroll=True)

    for l in range(n_layers):
        cur, prev = l % 2, 1 - (l % 2)
        for d in range(2):                        # 0 = forward, 1 = backward (time-reversed)
            wih_ref, whh_ref, b_ref = w_refs[6 * l + 3 * d: 6 * l + 3 * d + 3]
            if l == 0:
                xg = jnp.dot(x_ref[0], wih_ref[...], preferred_element_type=jnp.float32)
            else:
                # layer input = [fwd_out | bwd_out]; split the weight instead of concatenating.
                xg = (jnp.dot(fwd_bufs[prev][...], wih_ref[0:H, :],
                              preferred_element_type=jnp.float32) +
                      jnp.dot(bwd_bufs[prev][...], wih_ref[H:2 * H, :],
                              preferred_element_type=jnp.float32))
            xg_ref[...] = xg + b_ref[...]         # input-gate terms for every t, one matmul
            run_direction(whh_ref, fwd_bufs[cur] if d == 0 else bwd_bufs[cur], reverse=(d == 1))

    last = (n_layers - 1) % 2
    o_ref[0] = jnp.concatenate(
        [fwd_bufs[last][pl.ds(S - 1, 1), :], bwd_bufs[last][pl.ds(S - 1, 1), :]], axis=-1)


def lstm_last(x, lstm_params, *, n_hidden: int, n_layers: int):
    B, S, D = x.shape
    H = n_hidden
    flat = []
    in_specs = [pl.BlockSpec((1, S, D), lambda b: (b, 0, 0))]
    for (wih, whh, b) in lstm_params:
        for arr in (wih, whh, b):
            in_specs.append(pl.BlockSpec(arr.shape, lambda b_: (0, 0)))
            flat.append(arr)
    kernel = functools.partial(lstm_kernel, n_layers=n_layers, hidden=H, seq=S)
    out = pl.pallas_call(
        kernel,
        out_shape=jax.ShapeDtypeStruct((B, 1, 2 * H), jnp.float32),
        grid_spec=pltpu.PrefetchScalarGridSpec(
            num_scalar_prefetch=0,
            grid=(B,),
            in_specs=in_specs,
            out_specs=pl.BlockSpec((1, 1, 2 * H), lambda b: (b, 0, 0)),
            scratch_shapes=[pltpu.VMEM((S, 4 * H), jnp.float32),
                            pltpu.VMEM((S, H), jnp.float32),
                            pltpu.VMEM((S, H), jnp.float32),
                            pltpu.VMEM((S, H), jnp.float32),
                            pltpu.VMEM((S, H), jnp.float32)]),
        compiler_params=pltpu.CompilerParams(
            dimension_semantics=("parallel",),
            vmem_limit_bytes=32 * 1024 * 1024),
    )(x, *flat)
    return out[:, 0]


def al_encoder_forward(x, attn_params, lstm_params, *, heads, pad_dk, n_hidden, n_layers):
    y = attn_layernorm(x, attn_params, heads=heads, pad_dk=pad_dk)
    return lstm_last(y, lstm_params, n_hidden=n_hidden, n_layers=n_layers)


# ---------------------------------------------------------------------------
# Parameter construction (PyTorch layout) and host-side folding for the kernels
# ---------------------------------------------------------------------------
def init_raw_params(key, d_model, head_dims, n_hidden, n_layers):
    keys = iter(jax.random.split(key, 256))

    def u(shape, bound):
        return jax.random.uniform(next(keys), shape, jnp.float32, -bound, bound)

    raw = {"head_dims": head_dims,
           "wq": [], "bq": [], "wk": [], "bk": [], "wv": [], "bv": []}
    for dims in head_dims:
        n = len(dims)
        bound = 1.0 / math.sqrt(n)
        raw["wq"].append(u((n, n), bound)); raw["bq"].append(u((n,), bound))
        raw["wk"].append(u((n, n), bound)); raw["bk"].append(u((n,), bound))
        raw["wv"].append(u((n, n), bound)); raw["bv"].append(u((n,), bound))

    dim_size = sum(len(d) for d in head_dims)
    ob = 1.0 / math.sqrt(dim_size)
    raw["wo"] = u((d_model, dim_size), ob)
    raw["bo"] = u((d_model,), ob)
    raw["gamma"] = 1.0 + 0.1 * jax.random.normal(next(keys), (d_model,), jnp.float32)
    raw["beta"] = 0.1 * jax.random.normal(next(keys), (d_model,), jnp.float32)

    H = n_hidden
    hb = 1.0 / math.sqrt(H)
    raw["lstm"] = []
    in_size = d_model
    for _ in range(n_layers):
        layer = []
        for _ in range(2):  # forward, backward
            layer.append({"wih": u((4 * H, in_size), hb), "whh": u((4 * H, H), hb),
                          "bih": u((4 * H,), hb), "bhh": u((4 * H,), hb)})
        raw["lstm"].append(layer)
        in_size = 2 * H
    return raw


def prep_attention_params(raw, d_model):
    head_dims = raw["head_dims"]
    H = len(head_dims)
    P = max(len(d) for d in head_dims)

    wq = np.zeros((H, d_model, P), np.float32)
    wk = np.zeros_like(wq)
    wv = np.zeros_like(wq)
    bq = np.zeros((H, 1, P), np.float32)
    bk = np.zeros_like(bq)
    bv = np.zeros_like(bq)
    wo = np.zeros((H, P, d_model), np.float32)
    wo_raw = np.asarray(raw["wo"])                      # (d_model, dim_size)

    off = 0
    for h, dims in enumerate(head_dims):
        n = len(dims)
        idx = np.asarray(dims)
        scale = 1.0 / math.sqrt(n)                      # folded into Q (review #10)

        blk = np.zeros((d_model, P), np.float32)
        blk[idx, :n] = np.asarray(raw["wq"][h]).T * scale
        wq[h] = blk
        bq[h, 0, :n] = np.asarray(raw["bq"][h]) * scale

        blk = np.zeros((d_model, P), np.float32)
        blk[idx, :n] = np.asarray(raw["wk"][h]).T
        wk[h] = blk
        bk[h, 0, :n] = np.asarray(raw["bk"][h])

        blk = np.zeros((d_model, P), np.float32)
        blk[idx, :n] = np.asarray(raw["wv"][h]).T
        wv[h] = blk
        bv[h, 0, :n] = np.asarray(raw["bv"][h])

        wo[h, :n, :] = wo_raw[:, off:off + n].T
        off += n

    params = {
        "wq": jnp.asarray(wq, jnp.bfloat16), "bq": jnp.asarray(bq, jnp.float32),
        "wk": jnp.asarray(wk, jnp.bfloat16), "bk": jnp.asarray(bk, jnp.float32),
        "wv": jnp.asarray(wv, jnp.bfloat16), "bv": jnp.asarray(bv, jnp.float32),
        "wo": jnp.asarray(wo, jnp.bfloat16),
        "bo": jnp.asarray(np.asarray(raw["bo"]).reshape(1, d_model), jnp.float32),
        "gamma": jnp.asarray(np.asarray(raw["gamma"]).reshape(1, d_model), jnp.float32),
        "beta": jnp.asarray(np.asarray(raw["beta"]).reshape(1, d_model), jnp.float32),
    }
    return params, H, P


def prep_lstm_params(raw):
    flat = []
    for layer in raw["lstm"]:
        for d in layer:
            flat.append((jnp.asarray(d["wih"].T, jnp.float32),           # (in, 4H)
                         jnp.asarray(d["whh"].T, jnp.float32),           # (H, 4H)
                         jnp.asarray((d["bih"] + d["bhh"]).reshape(1, -1), jnp.float32)))
    return flat


# ---------------------------------------------------------------------------
# Pure-JAX f32 reference (mirrors the PyTorch forward exactly; dropout = eval identity)
# ---------------------------------------------------------------------------
def reference_attn_ln(x, raw, eps=1e-5):
    outs = []
    for h, dims in enumerate(raw["head_dims"]):
        idx = jnp.asarray(dims)
        a = x[:, :, idx]
        q = a @ raw["wq"][h].T + raw["bq"][h]
        k = a @ raw["wk"][h].T + raw["bk"][h]
        v = a @ raw["wv"][h].T + raw["bv"][h]
        s = jnp.einsum("bqd,bkd->bqk", q, k) / math.sqrt(len(dims))
        p = jax.nn.softmax(s, axis=-1)
        outs.append(jnp.einsum("bqk,bkd->bqd", p, v))
    cat = jnp.concatenate(outs, axis=-1)
    attn = cat @ raw["wo"].T + raw["bo"]
    y = x + attn
    mu = y.mean(-1, keepdims=True)
    var = ((y - mu) ** 2).mean(-1, keepdims=True)
    return (y - mu) / jnp.sqrt(var + eps) * raw["gamma"] + raw["beta"]


def reference_lstm_last(xs, raw, n_hidden, n_layers):
    H = n_hidden

    def run(x_seq, p, reverse):
        B, S, _ = x_seq.shape
        h = jnp.zeros((B, H), jnp.float32)
        c = jnp.zeros((B, H), jnp.float32)
        order = range(S - 1, -1, -1) if reverse else range(S)
        out = [None] * S
        for t in order:
            g = x_seq[:, t] @ p["wih"].T + p["bih"] + h @ p["whh"].T + p["bhh"]
            i = jax.nn.sigmoid(g[:, :H])
            f = jax.nn.sigmoid(g[:, H:2 * H])
            gg = jnp.tanh(g[:, 2 * H:3 * H])
            o = jax.nn.sigmoid(g[:, 3 * H:])
            c = f * c + i * gg
            h = o * jnp.tanh(c)
            out[t] = h
        return jnp.stack(out, axis=1)

    cur = xs
    for l in range(n_layers):
        fo = run(cur, raw["lstm"][l][0], False)
        bo = run(cur, raw["lstm"][l][1], True)
        cur = jnp.concatenate([fo, bo], axis=-1)
    return cur[:, -1]


# ---------------------------------------------------------------------------
if __name__ == "__main__":
    B, S, D = 2, 8, 32
    head_dims = [list(range(0, 8)), list(range(8, 20)), list(range(20, 32)),
                 [1, 5, 9, 13, 17, 21, 25, 29]]       # sizes 8, 12, 12, 8 (dim_size = 40)
    n_hidden, n_layers = 16, 2                        # dropout = 0.1 (identity at inference)

    key = jax.random.PRNGKey(0)
    kx, kp = jax.random.split(key)
    x = jax.random.normal(kx, (B, S, D), jnp.float32)
    raw = init_raw_params(kp, D, head_dims, n_hidden, n_layers)

    attn_params, H, P = prep_attention_params(raw, D)
    lstm_params = prep_lstm_params(raw)

    # Run the Pallas kernels.
    yln = attn_layernorm(x, attn_params, heads=H, pad_dk=P)
    out = lstm_last(yln, lstm_params, n_hidden=n_hidden, n_layers=n_layers)
    out = jax.block_until_ready(out)
    assert out.shape == (B, 2 * n_hidden)

    # References (pure f32 JAX mirroring the PyTorch module).
    yln_ref = reference_attn_ln(x, raw)
    out_ref = reference_lstm_last(yln_ref, raw, n_hidden, n_layers)

    # Stage checks: attention kernel uses bf16 matmul operands -> moderate tolerance;
    # LSTM kernel is pure f32 -> tight tolerance on the isolated stage.
    assert jnp.allclose(yln, yln_ref, atol=3e-2, rtol=3e-2), "attention+LayerNorm mismatch"
    out_lstm_only = jax.block_until_ready(
        lstm_last(yln_ref, lstm_params, n_hidden=n_hidden, n_layers=n_layers))
    assert jnp.allclose(out_lstm_only, out_ref, atol=2e-3, rtol=2e-3), "LSTM mismatch"
    # End-to-end sanity check.
    assert jnp.allclose(out, out_ref, atol=6e-2, rtol=6e-2), "end-to-end mismatch"

    print("KERNEL_OK")
</pallas_src>

<mosaic_0001>
module attributes {stable_mosaic.version = 11 : i64} {
  func.func @attn_ln_kernel(%arg0: i32, %arg1: i32, %arg2: memref<1x8x32xf32, #tpu.memory_space<vmem>>, %arg3: memref<1x8x32xf32, #tpu.memory_space<vmem>>, %arg4: memref<4x32x12xbf16, #tpu.memory_space<vmem>>, %arg5: memref<4x1x12xf32, #tpu.memory_space<vmem>>, %arg6: memref<4x32x12xbf16, #tpu.memory_space<vmem>>, %arg7: memref<4x1x12xf32, #tpu.memory_space<vmem>>, %arg8: memref<4x32x12xbf16, #tpu.memory_space<vmem>>, %arg9: memref<4x1x12xf32, #tpu.memory_space<vmem>>, %arg10: memref<4x12x32xbf16, #tpu.memory_space<vmem>>, %arg11: memref<1x32xf32, #tpu.memory_space<vmem>>, %arg12: memref<1x32xf32, #tpu.memory_space<vmem>>, %arg13: memref<1x32xf32, #tpu.memory_space<vmem>>, %arg14: memref<1x8x32xf32, #tpu.memory_space<vmem>>) attributes {dimension_semantics = [#tpu.dimension_semantics<parallel>, #tpu.dimension_semantics<parallel>], iteration_bounds = array<i64: 2, 1>, scalar_prefetch = 0 : i64, scratch_operands = 0 : i64, tpu.core_type = #tpu.core_type<tc>, window_params = [{transform_indices = @transform_0, window_bounds = array<i64: 1, 8, 32>}, {transform_indices = @transform_1, window_bounds = array<i64: 1, 8, 32>}, {pipeline_mode = #tpu.pipeline_mode<synchronous>, transform_indices = @transform_2, window_bounds = array<i64: 4, 32, 12>}, {pipeline_mode = #tpu.pipeline_mode<synchronous>, transform_indices = @transform_3, window_bounds = array<i64: 4, 1, 12>}, {pipeline_mode = #tpu.pipeline_mode<synchronous>, transform_indices = @transform_4, window_bounds = array<i64: 4, 32, 12>}, {pipeline_mode = #tpu.pipeline_mode<synchronous>, transform_indices = @transform_5, window_bounds = array<i64: 4, 1, 12>}, {pipeline_mode = #tpu.pipeline_mode<synchronous>, transform_indices = @transform_6, window_bounds = array<i64: 4, 32, 12>}, {pipeline_mode = #tpu.pipeline_mode<synchronous>, transform_indices = @transform_7, window_bounds = array<i64: 4, 1, 12>}, {pipeline_mode = #tpu.pipeline_mode<synchronous>, transform_indices = @transform_8, window_bounds = array<i64: 4, 12, 32>}, {pipeline_mode = #tpu.pipeline_mode<synchronous>, transform_indices = @transform_9, window_bounds = array<i64: 1, 32>}, {pipeline_mode = #tpu.pipeline_mode<synchronous>, transform_indices = @transform_10, window_bounds = array<i64: 1, 32>}, {pipeline_mode = #tpu.pipeline_mode<synchronous>, transform_indices = @transform_11, window_bounds = array<i64: 1, 32>}, {transform_indices = @transform_12, window_bounds = array<i64: 1, 8, 32>}]} {
    %c0 = arith.constant 0 : index
    %c0_0 = arith.constant 0 : index
    %c0_1 = arith.constant 0 : index
    %0 = vector.load %arg2[%c0, %c0_0, %c0_1] : memref<1x8x32xf32, #tpu.memory_space<vmem>>, vector<1x8x32xf32>
    %1 = vector.shape_cast %0 : vector<1x8x32xf32> to vector<8x32xf32>
    %c0_2 = arith.constant 0 : index
    %c0_3 = arith.constant 0 : index
    %c0_4 = arith.constant 0 : index
    %2 = vector.load %arg3[%c0_2, %c0_3, %c0_4] : memref<1x8x32xf32, #tpu.memory_space<vmem>>, vector<1x8x32xf32>
    %3 = vector.shape_cast %2 : vector<1x8x32xf32> to vector<8x32xf32>
    %4 = arith.truncf %1 : vector<8x32xf32> to vector<8x32xbf16>
    %5 = vector.shape_cast %4 : vector<8x32xbf16> to vector<1x8x32xbf16>
    %6 = vector.broadcast %5 : vector<1x8x32xbf16> to vector<4x8x32xbf16>
    %7 = arith.truncf %3 : vector<8x32xf32> to vector<8x32xbf16>
    %8 = vector.shape_cast %7 : vector<8x32xbf16> to vector<1x8x32xbf16>
    %9 = vector.broadcast %8 : vector<1x8x32xbf16> to vector<4x8x32xbf16>
    %c0_5 = arith.constant 0 : index
    %c0_6 = arith.constant 0 : index
    %c0_7 = arith.constant 0 : index
    %10 = vector.load %arg4[%c0_5, %c0_6, %c0_7] : memref<4x32x12xbf16, #tpu.memory_space<vmem>>, vector<4x32x12xbf16>
    "tpu.trace_start"() <{level = 10 : i32, message = "hsd,hdp->hsp"}> : () -> ()
    %cst = arith.constant dense<0.000000e+00> : vector<4x8x12xf32>
    %11 = tpu.matmul %6, %10, %cst {dimension_numbers = #tpu.dot_dimension_numbers<[2], [1], [1], [2], [0, 0, 0, 1, 1, 2], [0], [0]>} : vector<4x8x32xbf16>, vector<4x32x12xbf16>, vector<4x8x12xf32> -> vector<4x8x12xf32>
    "tpu.trace_stop"() : () -> ()
    %c0_8 = arith.constant 0 : index
    %c0_9 = arith.constant 0 : index
    %c0_10 = arith.constant 0 : index
    %12 = vector.load %arg5[%c0_8, %c0_9, %c0_10] : memref<4x1x12xf32, #tpu.memory_space<vmem>>, vector<4x1x12xf32>
    %13 = vector.broadcast %12 : vector<4x1x12xf32> to vector<4x8x12xf32>
    %14 = arith.addf %11, %13 : vector<4x8x12xf32>
    %c0_11 = arith.constant 0 : index
    %c0_12 = arith.constant 0 : index
    %c0_13 = arith.constant 0 : index
    %15 = vector.load %arg6[%c0_11, %c0_12, %c0_13] : memref<4x32x12xbf16, #tpu.memory_space<vmem>>, vector<4x32x12xbf16>
    "tpu.trace_start"() <{level = 10 : i32, message = "hsd,hdp->hsp"}> : () -> ()
    %cst_14 = arith.constant dense<0.000000e+00> : vector<4x8x12xf32>
    %16 = tpu.matmul %9, %15, %cst_14 {dimension_numbers = #tpu.dot_dimension_numbers<[2], [1], [1], [2], [0, 0, 0, 1, 1, 2], [0], [0]>} : vector<4x8x32xbf16>, vector<4x32x12xbf16>, vector<4x8x12xf32> -> vector<4x8x12xf32>
    "tpu.trace_stop"() : () -> ()
    %c0_15 = arith.constant 0 : index
    %c0_16 = arith.constant 0 : index
    %c0_17 = arith.constant 0 : index
    %17 = vector.load %arg7[%c0_15, %c0_16, %c0_17] : memref<4x1x12xf32, #tpu.memory_space<vmem>>, vector<4x1x12xf32>
    %18 = vector.broadcast %17 : vector<4x1x12xf32> to vector<4x8x12xf32>
    %19 = arith.addf %16, %18 : vector<4x8x12xf32>
    %c0_18 = arith.constant 0 : index
    %c0_19 = arith.constant 0 : index
    %c0_20 = arith.constant 0 : index
    %20 = vector.load %arg8[%c0_18, %c0_19, %c0_20] : memref<4x32x12xbf16, #tpu.memory_space<vmem>>, vector<4x32x12xbf16>
    "tpu.trace_start"() <{level = 10 : i32, message = "hsd,hdp->hsp"}> : () -> ()
    %cst_21 = arith.constant dense<0.000000e+00> : vector<4x8x12xf32>
    %21 = tpu.matmul %9, %20, %cst_21 {dimension_numbers = #tpu.dot_dimension_numbers<[2], [1], [1], [2], [0, 0, 0, 1, 1, 2], [0], [0]>} : vector<4x8x32xbf16>, vector<4x32x12xbf16>, vector<4x8x12xf32> -> vector<4x8x12xf32>
    "tpu.trace_stop"() : () -> ()
    %c0_22 = arith.constant 0 : index
    %c0_23 = arith.constant 0 : index
    %c0_24 = arith.constant 0 : index
    %22 = vector.load %arg9[%c0_22, %c0_23, %c0_24] : memref<4x1x12xf32, #tpu.memory_space<vmem>>, vector<4x1x12xf32>
    %23 = vector.broadcast %22 : vector<4x1x12xf32> to vector<4x8x12xf32>
    %24 = arith.addf %21, %23 : vector<4x8x12xf32>
    %25 = arith.truncf %14 : vector<4x8x12xf32> to vector<4x8x12xbf16>
    %26 = arith.truncf %19 : vector<4x8x12xf32> to vector<4x8x12xbf16>
    "tpu.trace_start"() <{level = 10 : i32, message = "hqp,hkp->hqk"}> : () -> ()
    %cst_25 = arith.constant dense<0.000000e+00> : vector<4x8x8xf32>
    %27 = tpu.matmul %25, %26, %cst_25 {dimension_numbers = #tpu.dot_dimension_numbers<[2], [2], [1], [1], [0, 0, 0, 1, 1, 1], [0], [0]>} : vector<4x8x12xbf16>, vector<4x8x12xbf16>, vector<4x8x8xf32> -> vector<4x8x8xf32>
    "tpu.trace_stop"() : () -> ()
    %cst_26 = arith.constant dense<0xFF800000> : vector<4x8xf32>
    %28 = vector.multi_reduction <maximumf>, %27, %cst_26 [2] : vector<4x8x8xf32> to vector<4x8xf32>
    %29 = vector.shape_cast %28 : vector<4x8xf32> to vector<4x8x1xf32>
    %30 = vector.broadcast %29 : vector<4x8x1xf32> to vector<4x8x8xf32>
    %31 = arith.subf %27, %30 : vector<4x8x8xf32>
    %32 = math.exp %31 : vector<4x8x8xf32>
    %cst_27 = arith.constant dense<0.000000e+00> : vector<4x8xf32>
    %33 = vector.multi_reduction <add>, %32, %cst_27 [2] : vector<4x8x8xf32> to vector<4x8xf32>
    %34 = vector.shape_cast %33 : vector<4x8xf32> to vector<4x8x1xf32>
    %35 = tpu.reciprocal %34 {approx = true} : vector<4x8x1xf32> -> vector<4x8x1xf32>
    %36 = vector.broadcast %35 : vector<4x8x1xf32> to vector<4x8x8xf32>
    %37 = arith.mulf %32, %36 : vector<4x8x8xf32>
    %38 = arith.truncf %37 : vector<4x8x8xf32> to vector<4x8x8xbf16>
    %39 = arith.truncf %24 : vector<4x8x12xf32> to vector<4x8x12xbf16>
    "tpu.trace_start"() <{level = 10 : i32, message = "hqk,hkp->hqp"}> : () -> ()
    %cst_28 = arith.constant dense<0.000000e+00> : vector<4x8x12xf32>
    %40 = tpu.matmul %38, %39, %cst_28 {dimension_numbers = #tpu.dot_dimension_numbers<[2], [1], [1], [2], [0, 0, 0, 1, 1, 2], [0], [0]>} : vector<4x8x8xbf16>, vector<4x8x12xbf16>, vector<4x8x12xf32> -> vector<4x8x12xf32>
    "tpu.trace_stop"() : () -> ()
    %41 = arith.truncf %40 : vector<4x8x12xf32> to vector<4x8x12xbf16>
    %c0_29 = arith.constant 0 : index
    %c0_30 = arith.constant 0 : index
    %c0_31 = arith.constant 0 : index
    %42 = vector.load %arg10[%c0_29, %c0_30, %c0_31] : memref<4x12x32xbf16, #tpu.memory_space<vmem>>, vector<4x12x32xbf16>
    "tpu.trace_start"() <{level = 10 : i32, message = "hqp,hpd->hqd"}> : () -> ()
    %cst_32 = arith.constant dense<0.000000e+00> : vector<4x8x32xf32>
    %43 = tpu.matmul %41, %42, %cst_32 {dimension_numbers = #tpu.dot_dimension_numbers<[2], [1], [1], [2], [0, 0, 0, 1, 1, 2], [0], [0]>} : vector<4x8x12xbf16>, vector<4x12x32xbf16>, vector<4x8x32xf32> -> vector<4x8x32xf32>
    "tpu.trace_stop"() : () -> ()
    %cst_33 = arith.constant dense<0.000000e+00> : vector<8x32xf32>
    %44 = vector.multi_reduction <add>, %43, %cst_33 [0] : vector<4x8x32xf32> to vector<8x32xf32>
    %c0_34 = arith.constant 0 : index
    %c0_35 = arith.constant 0 : index
    %45 = vector.load %arg11[%c0_34, %c0_35] : memref<1x32xf32, #tpu.memory_space<vmem>>, vector<1x32xf32>
    %46 = vector.broadcast %45 : vector<1x32xf32> to vector<8x32xf32>
    %47 = arith.addf %44, %46 : vector<8x32xf32>
    %48 = arith.addf %1, %47 : vector<8x32xf32>
    %cst_36 = arith.constant dense<0.000000e+00> : vector<8xf32>
    %49 = vector.multi_reduction <add>, %48, %cst_36 [1] : vector<8x32xf32> to vector<8xf32>
    %50 = vector.shape_cast %49 : vector<8xf32> to vector<8x1xf32>
    %cst_37 = arith.constant 3.200000e+01 : f32
    %51 = vector.broadcast %cst_37 : f32 to vector<8x1xf32>
    %52 = arith.divf %50, %51 : vector<8x1xf32>
    %53 = vector.broadcast %52 : vector<8x1xf32> to vector<8x32xf32>
    %54 = arith.subf %48, %53 : vector<8x32xf32>
    %55 = arith.mulf %54, %54 : vector<8x32xf32>
    %cst_38 = arith.constant dense<0.000000e+00> : vector<8xf32>
    %56 = vector.multi_reduction <add>, %55, %cst_38 [1] : vector<8x32xf32> to vector<8xf32>
    %57 = vector.shape_cast %56 : vector<8xf32> to vector<8x1xf32>
    %cst_39 = arith.constant 3.200000e+01 : f32
    %58 = vector.broadcast %cst_39 : f32 to vector<8x1xf32>
    %59 = arith.divf %57, %58 : vector<8x1xf32>
    %cst_40 = arith.constant 9.99999974E-6 : f32
    %60 = vector.broadcast %cst_40 : f32 to vector<8x1xf32>
    %61 = arith.addf %59, %60 : vector<8x1xf32>
    %62 = math.rsqrt %61 : vector<8x1xf32>
    %63 = vector.broadcast %62 : vector<8x1xf32> to vector<8x32xf32>
    %64 = arith.mulf %54, %63 : vector<8x32xf32>
    %c0_41 = arith.constant 0 : index
    %c0_42 = arith.constant 0 : index
    %65 = vector.load %arg12[%c0_41, %c0_42] : memref<1x32xf32, #tpu.memory_space<vmem>>, vector<1x32xf32>
    %66 = vector.broadcast %65 : vector<1x32xf32> to vector<8x32xf32>
    %67 = arith.mulf %64, %66 : vector<8x32xf32>
    %c0_43 = arith.constant 0 : index
    %c0_44 = arith.constant 0 : index
    %68 = vector.load %arg13[%c0_43, %c0_44] : memref<1x32xf32, #tpu.memory_space<vmem>>, vector<1x32xf32>
    %69 = vector.broadcast %68 : vector<1x32xf32> to vector<8x32xf32>
    %70 = arith.addf %67, %69 : vector<8x32xf32>
    %c0_45 = arith.constant 0 : index
    %c0_46 = arith.constant 0 : index
    %c0_47 = arith.constant 0 : index
    %71 = vector.load %arg14[%c0_45, %c0_46, %c0_47] : memref<1x8x32xf32, #tpu.memory_space<vmem>>, vector<1x8x32xf32>
    %72 = vector.shape_cast %71 : vector<1x8x32xf32> to vector<8x32xf32>
    %73 = vector.shape_cast %70 : vector<8x32xf32> to vector<1x8x32xf32>
    tpu.vector_store %arg14[%c0_45, %c0_46, %c0_47], %73 {strides = array<i32>} : memref<1x8x32xf32, #tpu.memory_space<vmem>>, vector<1x8x32xf32>,
    return
  }
  func.func @transform_0(%arg0: i32, %arg1: i32) -> (i32, i32, i32) {
    %c0_i32 = arith.constant 0 : i32
    %c0_i32_0 = arith.constant 0 : i32
    return %arg0, %arg1, %c0_i32 : i32, i32, i32
  }
  func.func @transform_1(%arg0: i32, %arg1: i32) -> (i32, i32, i32) {
    %c0_i32 = arith.constant 0 : i32
    %c0_i32_0 = arith.constant 0 : i32
    %c0_i32_1 = arith.constant 0 : i32
    return %arg0, %c0_i32, %c0_i32_0 : i32, i32, i32
  }
  func.func @transform_2(%arg0: i32, %arg1: i32) -> (i32, i32, i32) {
    %c0_i32 = arith.constant 0 : i32
    %c0_i32_0 = arith.constant 0 : i32
    %c0_i32_1 = arith.constant 0 : i32
    %c0_i32_2 = arith.constant 0 : i32
    return %c0_i32, %c0_i32_0, %c0_i32_1 : i32, i32, i32
  }
  func.func @transform_3(%arg0: i32, %arg1: i32) -> (i32, i32, i32) {
    %c0_i32 = arith.constant 0 : i32
    %c0_i32_0 = arith.constant 0 : i32
    %c0_i32_1 = arith.constant 0 : i32
    %c0_i32_2 = arith.constant 0 : i32
    return %c0_i32, %c0_i32_0, %c0_i32_1 : i32, i32, i32
  }
  func.func @transform_4(%arg0: i32, %arg1: i32) -> (i32, i32, i32) {
    %c0_i32 = arith.constant 0 : i32
    %c0_i32_0 = arith.constant 0 : i32
    %c0_i32_1 = arith.constant 0 : i32
    %c0_i32_2 = arith.constant 0 : i32
    return %c0_i32, %c0_i32_0, %c0_i32_1 : i32, i32, i32
  }
  func.func @transform_5(%arg0: i32, %arg1: i32) -> (i32, i32, i32) {
    %c0_i32 = arith.constant 0 : i32
    %c0_i32_0 = arith.constant 0 : i32
    %c0_i32_1 = arith.constant 0 : i32
    %c0_i32_2 = arith.constant 0 : i32
    return %c0_i32, %c0_i32_0, %c0_i32_1 : i32, i32, i32
  }
  func.func @transform_6(%arg0: i32, %arg1: i32) -> (i32, i32, i32) {
    %c0_i32 = arith.constant 0 : i32
    %c0_i32_0 = arith.constant 0 : i32
    %c0_i32_1 = arith.constant 0 : i32
    %c0_i32_2 = arith.constant 0 : i32
    return %c0_i32, %c0_i32_0, %c0_i32_1 : i32, i32, i32
  }
  func.func @transform_7(%arg0: i32, %arg1: i32) -> (i32, i32, i32) {
    %c0_i32 = arith.constant 0 : i32
    %c0_i32_0 = arith.constant 0 : i32
    %c0_i32_1 = arith.constant 0 : i32
    %c0_i32_2 = arith.constant 0 : i32
    return %c0_i32, %c0_i32_0, %c0_i32_1 : i32, i32, i32
  }
  func.func @transform_8(%arg0: i32, %arg1: i32) -> (i32, i32, i32) {
    %c0_i32 = arith.constant 0 : i32
    %c0_i32_0 = arith.constant 0 : i32
    %c0_i32_1 = arith.constant 0 : i32
    %c0_i32_2 = arith.constant 0 : i32
    return %c0_i32, %c0_i32_0, %c0_i32_1 : i32, i32, i32
  }
  func.func @transform_9(%arg0: i32, %arg1: i32) -> (i32, i32) {
    %c0_i32 = arith.constant 0 : i32
    %c0_i32_0 = arith.constant 0 : i32
    %c0_i32_1 = arith.constant 0 : i32
    return %c0_i32, %c0_i32_0 : i32, i32
  }
  func.func @transform_10(%arg0: i32, %arg1: i32) -> (i32, i32) {
    %c0_i32 = arith.constant 0 : i32
    %c0_i32_0 = arith.constant 0 : i32
    %c0_i32_1 = arith.constant 0 : i32
    return %c0_i32, %c0_i32_0 : i32, i32
  }
  func.func @transform_11(%arg0: i32, %arg1: i32) -> (i32, i32) {
    %c0_i32 = arith.constant 0 : i32
    %c0_i32_0 = arith.constant 0 : i32
    %c0_i32_1 = arith.constant 0 : i32
    return %c0_i32, %c0_i32_0 : i32, i32
  }
  func.func @transform_12(%arg0: i32, %arg1: i32) -> (i32, i32, i32) {
    %c0_i32 = arith.constant 0 : i32
    %c0_i32_0 = arith.constant 0 : i32
    return %arg0, %arg1, %c0_i32 : i32, i32, i32
  }
}

</mosaic_0001>

<bundles_post_ra>
// kernel: tpu_custom_call.1
= control target key start
LH: loop header
LB: loop body
LE: loop exit
PB: predicated region body
PF: predicated region fallthrough
CT: control target
= control target key end

     0   :  { %17 = vsyncpa [#allocation3], 0  ;;  %s2049_s0 = inlined_call_operand.vmem [shape: f32[2,8,32], index: 0, kind: input, shape index: {}]   ;;  %s2050_s1 = inlined_call_operand.vmem [shape: f32[2,8,32], index: 1, kind: input, shape index: {}]   ;;  %s2051_s2 = inlined_call_operand.vmem [shape: bf16[4,32,12], index: 2, kind: input, shape index: {}]   ;;  %s2052_s3 = inlined_call_operand.vmem [shape: f32[4,1,12], index: 3, kind: input, shape index: {}]   ;;  %s2053_s4 = inlined_call_operand.vmem [shape: bf16[4,32,12], index: 4, kind: input, shape index: {}]   ;;  %s2054_s5 = inlined_call_operand.vmem [shape: f32[4,1,12], index: 5, kind: input, shape index: {}]   ;;  %s2055_s6 = inlined_call_operand.vmem [shape: bf16[4,32,12], index: 6, kind: input, shape index: {}]   ;;  %s2056_s7 = inlined_call_operand.vmem [shape: f32[4,1,12], index: 7, kind: input, shape index: {}]   ;;  %s2057_s8 = inlined_call_operand.vmem [shape: bf16[4,12,32], index: 8, kind: input, shape index: {}]   ;;  %s2058_s9 = inlined_call_operand.vmem [shape: f32[1,32], index: 9, kind: input, shape index: {}]   ;;  %s2059_s10 = inlined_call_operand.vmem [shape: f32[1,32], index: 10, kind: input, shape index: {}]   ;;  %s2060_s11 = inlined_call_operand.vmem [shape: f32[1,32], index: 11, kind: input, shape index: {}]   ;;  %s2061_s12 = inlined_call_operand.hbm [shape: f32[2,8,32], index: 12, kind: output, shape index: {}]  }
   0x1   :  { %19 = vsyncpa [#allocation3 + $0x1], 0  ;;  %s1749_s21 = smov 0   ;;  %s1751_s22 = smov 0  }
   0x2   :  { %s1753_s23 = smov 0   ;;  %s1755_s24 = smov 0  }
   0x3   :  { %s1757_s25 = smov 0   ;;  %s1759_s26 = smov 0  }
   0x4 LB: > { %2067 = sst [smem:[#allocation5_spill]] %s1661_s21  ;;  %s1336_s27 = sadd.s32 4294967295, %s1681_s26   ;;  %s1681_s26 = sphi %s1759_s26, %s25_s26   ;;  %s1677_s25 = sphi %s1757_s25, %s2080_s25   ;;  %s1673_s24 = sphi %s1755_s24, %s2079_s24   ;;  %s1669_s23 = sphi %s1753_s23, %s2078_s23   ;;  %s1665_s22 = sphi %s1751_s22, %s2082_s22   ;;  %s1661_s21 = sphi %s1749_s21, %s2081_s21  }
   0x5   : > { %2068 = sst [smem:[#allocation6_spill]] %s1669_s23  ;;  %s1337_s28 = sadd.s32 4294967294, %s1681_s26  }
   0x6   : > { %2069 = sst [smem:[#allocation7_spill]] %s1677_s25  ;;  %s37_s29 = sadd.s32 1, %s1677_s25 }
   0x7   : > { %s310_s30 = sadd.s32 1, %s1669_s23  ;;  %p39_p0 = scmp.ge.s32.totalorder %s37_s29, 2 }
   0x8   : > { %p320_p1 = scmp.ne.s32.totalorder %s1669_s23, %s1665_s22  ;;  %p321_p2 = scmp.eq.s32.totalorder %s1336_s27, 1 }
   0x9   : > { %p326_p3 = scmp.ne.s32.totalorder %s1665_s22, %s1661_s21  ;;  %s2084_s29 = smov (%p39_p0, %s37_s29), 0 }
   0xa   : > { %2070 = sst [smem:[#allocation8_spill]] %s2084_s29  ;;  %p1789_p4 = por %p321_p2, %p320_p1 }
   0xb   : > { %p327_p5 = scmp.eq.s32.totalorder %s1337_s28, 1  ;;  %s305_s14 = ssub.s32 %s1677_s25, %s2084_s29 }
   0xc   : > { %p1340_p6 = scmp.ge.s32.totalorder %s1681_s26, 1  ;;  %p308_p7 = scmp.eq.s32.totalorder %s305_s14, 0 }
   0xd   : > { %p1796_p8 = por %p327_p5, %p326_p3  ;;  %p392_p9 = scmp.lt.s32.totalorder %s1681_s26, 3 }
   0xe   : > { %s1802_s16 = scalar_select %p308_p7, %s1669_s23, %s310_s30  }
   0xf   : > { %s2072_s15 = scalar_select %p1796_p8, 1, 0 }
  0x10   : > { %2074 = sst [smem:[#allocation10_spill]] %s1802_s16  ;;  %p393_p10 = pnand %p1340_p6, %p392_p9 }
  0x11   : > { %2073 = sst [smem:[#allocation9_spill]] %s2072_s15  ;;  %p440_p11 = scmp.lt.s32.totalorder (!%p393_p10), %s1673_s24, 1 }
  0x12   : > { %396 = sbr.rel (%p393_p10) target bundleno = 1133 (0x46d), region = 68 }
  0x17   : > { %v1485_v0 = vld [vmem:[%s2051_s2 + $0x8] sm:$0xff]  ;;  %v1487_v1 = vld [vmem:[%s2051_s2 + $0x18] sm:$0xff]  ;;  %v1484_v4 = vld [vmem:[%s2051_s2] sm:$0xff]  ;;  %s1824_s19 = scalar_select %p440_p11, %s1673_s24, 1  ;;  %vm500_vm0 = vcmask 261120   ;;  %vm867_vm1 = vcmask 97280  }
  0x18   : > { %v1489_v2 = vld [vmem:[%s2051_s2 + $0x28] sm:$0xff]  ;;  %v1491_v3 = vld [vmem:[%s2051_s2 + $0x38] sm:$0xff]  ;;  %510 = vmatpush.bf16.msra.mxu0 %v1485_v0  ;;  %535 = vmatpush.bf16.msra.mxu1 %v1487_v1  ;;  %v1486_v5 = vld [vmem:[%s2051_s2 + $0x10] sm:$0xff]  ;;  %vm1000_vm2 = vcmask 1043456   ;;  %vm944_vm3 = vcmask 64512   ;;  %vm1094_vm4 = vcmask 1045504  }
  0x19   : > { %560 = vmatpush.bf16.msra.mxu2 %v1489_v2  ;;  %585 = vmatpush.bf16.msra.mxu3 %v1491_v3  ;;  %v1488_v6 = vld [vmem:[%s2051_s2 + $0x20] sm:$0xff]  ;;  %v1490_v7 = vld [vmem:[%s2051_s2 + $0x30] sm:$0xff]  ;;  %s1342_s30 = sshll.u32 %s1824_s19, 3  ;;  %v1493_v8 = vld [vmem:[%s2053_s4 + $0x8] sm:$0xff]  ;;  %s437_s19 = sand.u32 1, %s1665_s22  }
  0x1a   : > { %v1495_v9 = vld [vmem:[%s2053_s4 + $0x18] sm:$0xff]  ;;  %s446_s15 = scalar_lea.vmem %s2049_s0, %s1342_s30  ;;  %v1497_v10 = vld [vmem:[%s2053_s4 + $0x28] sm:$0xff]  ;;  %v1492_v13 = vld [vmem:[%s2053_s4] sm:$0xff]  ;;  %s450_s20 = scalar_lea.vmem %s2050_s1, %s1342_s30 }
  0x1b   : > { %v1499_v11 = vld [vmem:[%s2053_s4 + $0x38] sm:$0xff]  ;;  %v1848_v12 = vld [vmem:[%s446_s15] sm:$0xff]  ;;  %v1494_v14 = vld [vmem:[%s2053_s4 + $0x10] sm:$0xff]  ;;  %s1341_s14 = sshll.u32 %s437_s19, 3  ;;  %s1481_s30 = sshll.u32 %s1673_s24, 3 }
  0x1c   : > { %511 = vmatpush.bf16.msra.mxu0 %v1484_v4  ;;  %536 = vmatpush.bf16.msra.mxu1 %v1486_v5  ;;  %v454_v15 = vpack.c.bf16 %v1848_v12, %v1848_v12  ;;  %v1496_v16 = vld [vmem:[%s2053_s4 + $0x20] sm:$0xff]  ;;  %v1498_v17 = vld [vmem:[%s2053_s4 + $0x30] sm:$0xff]  ;;  %v1505_v20 = vld [vmem:[%s2055_s6 + $0x28] sm:$0xff]  ;;  %s1248_s16 = scalar_lea.hbm %s2061_s12, %s1481_s30  ;;  %s439_s18 = scalar_lea.vmem [#allocation2], %s1341_s14 }
  0x1d   : > { %561 = vmatpush.bf16.msra.mxu2 %v1488_v6  ;;  %586 = vmatpush.bf16.msra.mxu3 %v1490_v7  ;;  %v453_v18 = vld [vmem:[%s450_s20] sm:$0xff]  ;;  %v1501_v21 = vld [vmem:[%s2055_s6 + $0x8] sm:$0xff]  ;;  %v1503_v22 = vld [vmem:[%s2055_s6 + $0x18] sm:$0xff]  ;;  %s1250_s24 = sshll.u32 %s439_s18, 4  ;;  %s1252_s20 = sshll.u32 %s1248_s16, 4  ;;  %s1251_s24 = int_to_ptr.vmem [resolvable:$true] %s1250_s24  ;;  %s1253_s20 = int_to_ptr.hbm [resolvable:$true] %s1252_s20 }
  0x1e   : > { %v455_v19 = vpack.c.bf16 %v453_v18, %v453_v18  ;;  %v1504_v23 = vld [vmem:[%s2055_s6 + $0x20] sm:$0xff]  ;;  %v1502_v25 = vld [vmem:[%s2055_s6 + $0x10] sm:$0xff]  ;;  %v1507_v26 = vld [vmem:[%s2055_s6 + $0x38] sm:$0xff]  ;;  %s1237_s27 = scalar_lea.sflag [#allocation3], %s437_s19  ;;  %s1617_s28 = sshra.s32 %s1253_s20, 4  ;;  %s1618_s28 = int_to_ptr.hbm [resolvable:$true] %s1617_s28 }
  0x1f   : > { %1352 = vmatmul.msk.bf16.vlgmr.msra.gmra.mxu0 %vm500_vm0, %v454_v15  ;;  %1361 = vmatmul.msk.bf16.vlgmr.msra.gmra.mxu1 %vm500_vm0, %v454_v15  ;;  %v1500_v24 = vld [vmem:[%s2055_s6] sm:$0xff]  ;;  %v1506_v27 = vld [vmem:[%s2055_s6 + $0x30] sm:$0xff]  ;;  %s1619_s30 = scalar_lea.hbm %s1618_s28, 8  ;;  %s1623_s14 = scalar_lea.hbm %s2061_s12, 16 }
  0x20   : > { %645 = vmatpush.bf16.msrb.mxu0 %v1493_v8  ;;  %670 = vmatpush.bf16.msrb.mxu1 %v1495_v9  ;;  %v1572_v34 = vld [vmem:[%s2054_s5] ss:$0 sm:$0xff]  ;;  %v1573_v35 = vld [vmem:[%s2054_s5 + $0x1] ss:$0 sm:$0xff]  ;;  %v1574_v46 = vld [vmem:[%s2054_s5 + $0x2] ss:$0 sm:$0xff]  ;;  %p1620_p12 = scmp.ne.s32.totalorder %s1618_s28, %s1619_s30  ;;  %p1624_p1 = scmp.lt.s32.totalorder %s1618_s28, %s2061_s12 }
  0x21   : > { %1370 = vmatmul.msk.bf16.vlgmr.msra.gmra.mxu2 %vm500_vm0, %v454_v15  ;;  %1379 = vmatmul.msk.bf16.vlgmr.msra.gmra.mxu3 %vm500_vm0, %v454_v15  ;;  %v1569_v42 = vld [vmem:[%s2052_s3 + $0x1] ss:$0 sm:$0xff]  ;;  %v1568_v45 = vld [vmem:[%s2052_s3] ss:$0 sm:$0xff]  ;;  %v1575_v47 = vld [vmem:[%s2054_s5 + $0x3] ss:$0 sm:$0xff]  ;;  %p1625_p2 = scmp.lt.s32.totalorder %s1623_s14, %s1619_s30 }
  0x22   : > { %695 = vmatpush.bf16.msrb.mxu2 %v1497_v10  ;;  %720 = vmatpush.bf16.msrb.mxu3 %v1499_v11  ;;  %v1570_v59 = vld [vmem:[%s2052_s3 + $0x2] ss:$0 sm:$0xff]  ;;  %v1571_v60 = vld [vmem:[%s2052_s3 + $0x3] ss:$0 sm:$0xff]  ;;  %v1576_v8 = vld [vmem:[%s2056_s7] ss:$0 sm:$0xff]  ;;  %p1621_p13 = pnand %p1620_p12, %p1789_p4 }
  0x23   : > { %v1577_v9 = vld [vmem:[%s2056_s7 + $0x1] ss:$0 sm:$0xff]  ;;  %v1578_v15 = vld [vmem:[%s2056_s7 + $0x2] ss:$0 sm:$0xff]  ;;  %p1626_p3 = por %p1625_p2, %p1624_p1 }
  0x24   : > { %646 = vmatpush.bf16.msrb.mxu0 %v1492_v13  ;;  %671 = vmatpush.bf16.msrb.mxu1 %v1494_v14  ;;  %p1622_p0 = pneg %p1621_p13 }
  0x26   : > { %696 = vmatpush.bf16.msrb.mxu2 %v1496_v16  ;;  %721 = vmatpush.bf16.msrb.mxu3 %v1498_v17  ;;  %p1627_p5 = pnand %p1626_p3, %p1622_p0 }
  0x28   : > { %777 = vmatpush.bf16.msra.mxu0 %v1501_v21  ;;  %802 = vmatpush.bf16.msra.mxu1 %v1503_v22 }
  0x2a   : > { %827 = vmatpush.bf16.msra.mxu2 %v1505_v20  ;;  %852 = vmatpush.bf16.msra.mxu3 %v1507_v26  ;;  %v1579_v26 = vld [vmem:[%s2056_s7 + $0x3] ss:$0 sm:$0xff] }
  0x2c   : > { %778 = vmatpush.bf16.msra.mxu0 %v1500_v24  ;;  %803 = vmatpush.bf16.msra.mxu1 %v1502_v25 }
  0x2e   : > { %828 = vmatpush.bf16.msra.mxu2 %v1504_v23  ;;  %853 = vmatpush.bf16.msra.mxu3 %v1506_v27 }
  0x2f   : > { %1388 = vmatmul.msk.bf16.vlgmr.msrb.gmra.mxu0 %vm500_vm0, %v455_v19  ;;  %1397 = vmatmul.msk.bf16.vlgmr.msrb.gmra.mxu1 %vm500_vm0, %v455_v19 }
  0x31   : > { %1406 = vmatmul.msk.bf16.vlgmr.msrb.gmra.mxu2 %vm500_vm0, %v455_v19  ;;  %1415 = vmatmul.msk.bf16.vlgmr.msrb.gmra.mxu3 %vm500_vm0, %v455_v19 }
  0x3f   : > { %1424 = vmatmul.msk.bf16.vlgmr.msra.gmra.mxu0 %vm500_vm0, %v455_v19  ;;  %1433 = vmatmul.msk.bf16.vlgmr.msra.gmra.mxu1 %vm500_vm0, %v455_v19 }
  0x41   : > { %1442 = vmatmul.msk.bf16.vlgmr.msra.gmra.mxu2 %vm500_vm0, %v455_v19  ;;  %1451 = vmatmul.msk.bf16.vlgmr.msra.gmra.mxu3 %vm500_vm0, %v455_v19 }
  0x9c   : > { %v513_v28 = vpop.f32.mrf.mxu0  ;;  %v538_v29 = vpop.f32.mrf.mxu1 }
  0x9d   : > { %v539_v50 = vadd.f32 %v1569_v42, %v538_v29  ;;  %v514_v53 = vadd.f32 %v1568_v45, %v513_v28 }
  0x9f   : > { %v860_v58 = vpack.c.bf16 %v539_v50, %v539_v50  ;;  %v859_v63 = vpack.c.bf16 %v514_v53, %v514_v53 }
  0xa4   : > { %v563_v30 = vpop.f32.mrf.mxu2  ;;  %v588_v31 = vpop.f32.mrf.mxu3 }
  0xa5   : > { %v515_v32 = vpop.f32.mrf.mxu0  ;;  %v540_v33 = vpop.f32.mrf.mxu1  ;;  %v564_v2 = vadd.f32 %v1570_v59, %v563_v30  ;;  %v589_v3 = vadd.f32 %v1571_v60, %v588_v31 }
  0xa7   : > { %v861_v6 = vpack.c.bf16 %v564_v2, %v564_v2  ;;  %v862_v7 = vpack.c.bf16 %v589_v3, %v589_v3 }
  0xac   : > { %v565_v36 = vpop.f32.mrf.mxu2  ;;  %v590_v37 = vpop.f32.mrf.mxu3 }
  0xad   : > { %v648_v38 = vpop.f32.mrf.mxu0  ;;  %v673_v39 = vpop.f32.mrf.mxu1 }
  0xae   : > { %v649_v40 = vadd.f32 %v1572_v34, %v648_v38  ;;  %v674_v41 = vadd.f32 %v1573_v35, %v673_v39 }
  0xb0   : > { %v863_v43 = vpack.c.bf16 %v649_v40, %v649_v40  ;;  %v864_v44 = vpack.c.bf16 %v674_v41, %v674_v41 }
  0xb2   : > { %v872_v48 = vsel %vm867_vm1, %v863_v43, 0  ;;  %v891_v49 = vsel %vm867_vm1, %v864_v44, 0 }
  0xb3   : > { %881 = vmatpush.bf16.xpose.msrb.mxu0 %v872_v48  ;;  %900 = vmatpush.bf16.xpose.msrb.mxu1 %v891_v49 }
  0xb4   : > { %v698_v51 = vpop.f32.mrf.mxu2  ;;  %v723_v52 = vpop.f32.mrf.mxu3 }
  0xb5   : > { %v699_v54 = vadd.f32 %v1574_v46, %v698_v51  ;;  %v724_v55 = vadd.f32 %v1575_v47, %v723_v52  ;;  %v650_v56 = vpop.f32.mrf.mxu0  ;;  %v675_v57 = vpop.f32.mrf.mxu1 }
  0xb7   : > { %v865_v61 = vpack.c.bf16 %v699_v54, %v699_v54  ;;  %v866_v62 = vpack.c.bf16 %v724_v55, %v724_v55 }
  0xb9   : > { %v910_v0 = vsel %vm867_vm1, %v865_v61, 0  ;;  %v929_v1 = vsel %vm867_vm1, %v866_v62, 0 }
  0xba   : > { %919 = vmatpush.bf16.xpose.msrb.mxu2 %v910_v0  ;;  %938 = vmatpush.bf16.xpose.msrb.mxu3 %v929_v1 }
  0xbb   : > { %1452 = vmatmul.msk.bf16.vlgmr.msrb.gmra.mxu0 %vm867_vm1, %v859_v63  ;;  %1453 = vmatmul.msk.bf16.vlgmr.msrb.gmra.mxu1 %vm867_vm1, %v860_v58 }
  0xbc   : > { %v700_v4 = vpop.f32.mrf.mxu2  ;;  %v725_v5 = vpop.f32.mrf.mxu3 }
  0xbd   : > { %v780_v10 = vpop.f32.mrf.mxu0  ;;  %v805_v11 = vpop.f32.mrf.mxu1 }
  0xbe   : > { %v781_v13 = vadd.f32 %v1576_v8, %v780_v10  ;;  %v806_v14 = vadd.f32 %v1577_v9, %v805_v11 }
  0xc0   : > { %v993_v16 = vpack.c.bf16 %v781_v13, %v781_v13  ;;  %v994_v17 = vpack.c.bf16 %v806_v14, %v806_v14 }
  0xc1   : > { %1454 = vmatmul.msk.bf16.vlgmr.msrb.gmra.mxu2 %vm867_vm1, %v861_v6  ;;  %1455 = vmatmul.msk.bf16.vlgmr.msrb.gmra.mxu3 %vm867_vm1, %v862_v7 }
  0xc2   : > { %v1002_v19 = vsel %vm1000_vm2, %v993_v16, 0  ;;  %v1021_v20 = vsel %vm1000_vm2, %v994_v17, 0 }
  0xc3   : > { %1011 = vmatpush.bf16.msra.mxu0 %v1002_v19  ;;  %1030 = vmatpush.bf16.msra.mxu1 %v1021_v20  ;;  %v1508_v19 = vld [vmem:[%s2057_s8] sm:$0x30] }
  0xc4   : > { %v830_v18 = vpop.f32.mrf.mxu2  ;;  %v855_v27 = vpop.f32.mrf.mxu3 }
  0xc5   : > { %v831_v21 = vadd.f32 %v1578_v15, %v830_v18  ;;  %v782_v23 = vpop.f32.mrf.mxu0  ;;  %v807_v24 = vpop.f32.mrf.mxu1  ;;  %v856_v29 = vadd.f32 %v1579_v26, %v855_v27  ;;  %v1462_v18 = vld [vmem:[%s2057_s8] sm:$0xf]  ;;  %v1472_v26 = vld [vmem:[%s2057_s8 + $0x10] sm:$0xf]  ;;  %v1510_v27 = vld [vmem:[%s2057_s8 + $0x10] sm:$0x30] }
  0xc6   : > { %v1463_v20 = vor.u32 %v1508_v19, %v1462_v18  ;;  %v1509_v23 = vld [vmem:[%s2057_s8 + $0x8] sm:$0x30] }
  0xc7   : > { %v995_v22 = vpack.c.bf16 %v831_v21, %v831_v21  ;;  %v996_v30 = vpack.c.bf16 %v856_v29, %v856_v29 }
  0xc8   : > { %v1096_v21 = vsel %vm1094_vm4, %v1463_v20, 0 }
  0xc9   : > { %v1040_v25 = vsel %vm1000_vm2, %v995_v22, 0  ;;  %v1059_v31 = vsel %vm1000_vm2, %v996_v30, 0  ;;  %1105 = vmatpush.bf16.msrb.mxu0 %v1096_v21  ;;  %v1467_v22 = vld [vmem:[%s2057_s8 + $0x8] sm:$0xf]  ;;  %v1477_v30 = vld [vmem:[%s2057_s8 + $0x18] sm:$0xf] }
  0xca   : > { %1049 = vmatpush.bf16.msra.mxu2 %v1040_v25  ;;  %1068 = vmatpush.bf16.msra.mxu3 %v1059_v31  ;;  %v1468_v24 = vor.u32 %v1509_v23, %v1467_v22  ;;  %v1511_v31 = vld [vmem:[%s2057_s8 + $0x18] sm:$0x30]  ;;  %v1581_v22 = vld [vmem:[%s2059_s10] ss:$0 sm:$0xff] }
  0xcc   : > { %v832_v28 = vpop.f32.mrf.mxu2  ;;  %v857_v32 = vpop.f32.mrf.mxu3  ;;  %v1120_v25 = vsel %vm1094_vm4, %v1468_v24, 0 }
  0xcd   : > { %1129 = vmatpush.bf16.msrb.mxu1 %v1120_v25  ;;  %v1473_v28 = vor.u32 %v1510_v27, %v1472_v26  ;;  %v1478_v32 = vor.u32 %v1511_v31, %v1477_v30  ;;  %v1582_v25 = vld [vmem:[%s2060_s11] ss:$0 sm:$0xff] }
  0xcf   : > { %v1144_v29 = vsel %vm1094_vm4, %v1473_v28, 0 }
  0xd0   : > { %1153 = vmatpush.bf16.msrb.mxu2 %v1144_v29 }
 0x138   : > { %v883_v33 = vpop.f32.mrf.mxu0  ;;  %v902_v34 = vpop.f32.mrf.mxu1 }
 0x139   : > { %v945_v35 = vsel %vm944_vm3, %v883_v33, -inf  ;;  %v948_v38 = vsel %vm944_vm3, %v902_v34, -inf }
 0x13a   : > { %946 = vmax.xlane.f32.xlu1 %v945_v35 }
 0x140   : > { %v885_v36 = vpop.f32.mrf.mxu0  ;;  %v904_v37 = vpop.f32.mrf.mxu1 }
 0x142   : > { %949 = vmax.xlane.f32.xlu1 %v948_v38 }
 0x144   : > { %v921_v39 = vpop.f32.mrf.mxu2  ;;  %v940_v40 = vpop.f32.mrf.mxu3 }
 0x145   : > { %v951_v41 = vsel %vm944_vm3, %v921_v39, -inf  ;;  %v954_v44 = vsel %vm944_vm3, %v940_v40, -inf }
 0x146   : > { %952 = vmax.xlane.f32.xlu0 %v951_v41 }
 0x14c   : > { %v923_v42 = vpop.f32.mrf.mxu2  ;;  %v942_v43 = vpop.f32.mrf.mxu3 }
 0x14e   : > { %955 = vmax.xlane.f32.xlu0 %v954_v44 }
 0x1ad   : > { %v947_v45 = vpop.xlane.xlu1 %946 }
 0x1ae   : > { %v957_v46 = vsub.f32 %v883_v33, %v947_v45  ;;  %v1168_v33 = vsel %vm1094_vm4, %v1478_v32, 0 }
 0x1af   : > { %1177 = vmatpush.bf16.msrb.mxu3 %v1168_v33 }
 0x1b0   : > { %v961_v47 = vmul.f32 1.442695, %v957_v46 }
 0x1b2   : > { %1583 = vpow2.f32 %v961_v47 }
 0x1b5   : > { %v950_v48 = vpop.xlane.xlu1 %949 }
 0x1b6   : > { %v958_v49 = vsub.f32 %v902_v34, %v950_v48 }
 0x1b8   : > { %v1584_v50 = vpop.eup %1583  ;;  %v963_v51 = vmul.f32 1.442695, %v958_v49 }
 0x1b9   : > { %v953_v52 = vpop.xlane.xlu0 %952  ;;  %v969_v53 = vsel %vm944_vm3, %v1584_v50, 0.0 }
 0x1ba   : > { %1585 = vpow2.f32 %v963_v51  ;;  %v959_v54 = vsub.f32 %v921_v39, %v953_v52  ;;  %970 = vadd.xlane.f32.xlu0 %v969_v53 }
 0x1bc   : > { %v965_v55 = vmul.f32 1.442695, %v959_v54 }
 0x1be   : > { %1587 = vpow2.f32 %v965_v55 }
 0x1c0   : > { %v1586_v56 = vpop.eup %1585 }
 0x1c1   : > { %v956_v57 = vpop.xlane.xlu0 %955  ;;  %v972_v58 = vsel %vm944_vm3, %v1586_v56, 0.0 }
 0x1c2   : > { %v960_v59 = vsub.f32 %v940_v40, %v956_v57  ;;  %973 = vadd.xlane.f32.xlu1 %v972_v58  ;;  %v1580_v58 = vld [vmem:[%s2058_s9] ss:$0 sm:$0xff] }
 0x1c4   : > { %v1588_v60 = vpop.eup %1587  ;;  %v967_v61 = vmul.f32 1.442695, %v960_v59 }
 0x1c5   : > { %v975_v62 = vsel %vm944_vm3, %v1588_v60, 0.0 }
 0x1c6   : > { %1589 = vpow2.f32 %v967_v61  ;;  %976 = vadd.xlane.f32.xlu2 %v975_v62 }
 0x1cc   : > { %v1590_v63 = vpop.eup %1589 }
 0x1cd   : > { %v978_v0 = vsel %vm944_vm3, %v1590_v63, 0.0 }
 0x1ce   : > { %979 = vadd.xlane.f32.xlu2 %v978_v0 }
 0x22d   : > { %v971_v1 = vpop.xlane.xlu0 %970 }
 0x22e   : > { %1591 = vrcp.f32 %v971_v1  ;;  %v1683_v1 = vmov 32.0  }
 0x234   : > { %v1592_v2 = vpop.eup %1591 }
 0x235   : > { %v985_v3 = vmul.f32 %v1592_v2, %v1584_v50  ;;  %v974_v4 = vpop.xlane.xlu1 %973 }
 0x236   : > { %1593 = vrcp.f32 %v974_v4 }
 0x237   : > { %v989_v5 = vpack.c.bf16 %v985_v3, %v985_v3 }
 0x239   : > { %v977_v6 = vpop.xlane.xlu2 %976  ;;  %1456 = vmatmul.msk.bf16.vlgmr.msra.gmra.mxu0 %vm944_vm3, %v989_v5 }
 0x23a   : > { %1595 = vrcp.f32 %v977_v6 }
 0x23c   : > { %v1594_v7 = vpop.eup %1593 }
 0x23d   : > { %v986_v8 = vmul.f32 %v1594_v7, %v1586_v56 }
 0x23f   : > { %v990_v9 = vpack.c.bf16 %v986_v8, %v986_v8 }
 0x240   : > { %v1596_v10 = vpop.eup %1595 }
 0x241   : > { %v987_v11 = vmul.f32 %v1596_v10, %v1588_v60  ;;  %v980_v13 = vpop.xlane.xlu2 %979  ;;  %1457 = vmatmul.msk.bf16.vlgmr.msra.gmra.mxu1 %vm944_vm3, %v990_v9 }
 0x242   : > { %1597 = vrcp.f32 %v980_v13 }
 0x243   : > { %v991_v14 = vpack.c.bf16 %v987_v11, %v987_v11  ;;  %1599 = vrcp.f32 %v1683_v1 }
 0x245   : > { %1458 = vmatmul.msk.bf16.vlgmr.msra.gmra.mxu2 %vm944_vm3, %v991_v14 }
 0x248   : > { %v1598_v15 = vpop.eup %1597 }
 0x249   : > { %v988_v16 = vmul.f32 %v1598_v15, %v1590_v63  ;;  %v1600_v2 = vpop.eup %1599 }
 0x24a   : > { %v1200_v3 = vmul.f32 32.0, %v1600_v2  ;;  %vm1204_vm5 = vweird.f32 %v1600_v2 }
 0x24b   : > { %v992_v17 = vpack.c.bf16 %v988_v16, %v988_v16 }
 0x24c   : > { %v1201_v4 = vsub.f32 1.0, %v1200_v3 }
 0x24d   : > { %1459 = vmatmul.msk.bf16.vlgmr.msra.gmra.mxu3 %vm944_vm3, %v992_v17 }
 0x24e   : > { %v1202_v5 = vmul.f32 %v1600_v2, %v1201_v4 }
 0x250   : > { %v1203_v6 = vadd.f32 %v1600_v2, %v1202_v5 }
 0x252   : > { %v1205_v7 = vsel %vm1204_vm5, %v1600_v2, %v1203_v6 }
 0x2b6   : > { %v1013_v34 = vpop.f32.mrf.mxu0 }
 0x2b7   : > { %v1074_v35 = vpack.c.bf16 %v1013_v34, %v1013_v34 }
 0x2b9   : > { %1464 = vmatmul.msk.bf16.vlgmr.msrb.gmra.mxu0 %vm867_vm1, %v1074_v35 }
 0x2be   : > { %v1015_v36 = vpop.f32.mrf.mxu0  ;;  %v1032_v37 = vpop.f32.mrf.mxu1 }
 0x2bf   : > { %v1075_v38 = vpack.c.bf16 %v1032_v37, %v1032_v37 }
 0x2c1   : > { %1469 = vmatmul.msk.bf16.vlgmr.msrb.gmra.mxu1 %vm867_vm1, %v1075_v38 }
 0x2c6   : > { %v1034_v39 = vpop.f32.mrf.mxu1 }
 0x2c8   : > { %v1051_v40 = vpop.f32.mrf.mxu2 }
 0x2c9   : > { %v1076_v41 = vpack.c.bf16 %v1051_v40, %v1051_v40 }
 0x2cb   : > { %1474 = vmatmul.msk.bf16.vlgmr.msrb.gmra.mxu2 %vm867_vm1, %v1076_v41 }
 0x2d0   : > { %v1053_v42 = vpop.f32.mrf.mxu2  ;;  %v1070_v43 = vpop.f32.mrf.mxu3 }
 0x2d1   : > { %v1077_v44 = vpack.c.bf16 %v1070_v43, %v1070_v43 }
 0x2d3   : > { %1479 = vmatmul.msk.bf16.vlgmr.msrb.gmra.mxu3 %vm867_vm1, %v1077_v44 }
 0x2d8   : > { %v1072_v45 = vpop.f32.mrf.mxu3 }
 0x336   : > { %v1107_v46 = vpop.f32.mrf.mxu0 }
 0x337   : > { %v1183_v52 = vsel %vm500_vm0, %v1107_v46, 0.0 }
 0x33e   : > { %v1109_v47 = vpop.f32.mrf.mxu0  ;;  %v1131_v48 = vpop.f32.mrf.mxu1 }
 0x33f   : > { %v1184_v51 = vsel %vm500_vm0, %v1131_v48, 0.0 }
 0x340   : > { %v1185_v54 = vadd.f32 %v1184_v51, %v1183_v52 }
 0x346   : > { %v1133_v49 = vpop.f32.mrf.mxu1 }
 0x34e   : > { %v1155_v50 = vpop.f32.mrf.mxu2 }
 0x34f   : > { %v1186_v53 = vsel %vm500_vm0, %v1155_v50, 0.0 }
 0x350   : > { %v1187_v55 = vadd.f32 %v1186_v53, %v1185_v54 }
 0x356   : > { %v1157_v56 = vpop.f32.mrf.mxu2  ;;  %v1179_v57 = vpop.f32.mrf.mxu3 }
 0x357   : > { %v1188_v59 = vsel %vm500_vm0, %v1179_v57, 0.0 }
 0x358   : > { %v1189_v60 = vadd.f32 %v1188_v59, %v1187_v55 }
 0x35a   : > { %v1194_v61 = vadd.f32 %v1580_v58, %v1189_v60 }
 0x35c   : > { %v1195_v62 = vadd.f32 %v1194_v61, %v1848_v12 }
 0x35e   : > { %v1181_v63 = vpop.f32.mrf.mxu3  ;;  %v1196_v0 = vsel %vm500_vm0, %v1195_v62, 0.0 }
 0x35f   : > { %1197 = vadd.xlane.f32.xlu2 %v1196_v0 }
 0x3d2   : > { %v1198_v8 = vpop.xlane.xlu2 %1197 }
 0x3d3   : > { %v1206_v9 = vmul.f32 %v1205_v7, %v1198_v8 }
 0x3d5   : > { %v1207_v10 = vsub.f32 %v1195_v62, %v1206_v9 }
 0x3d7   : > { %v1208_v11 = vmul.f32 %v1207_v10, %v1207_v10 }
 0x3d9   : > { %v1209_v12 = vsel %vm500_vm0, %v1208_v11, 0.0 }
 0x3da   : > { %1210 = vadd.xlane.f32.xlu0 %v1209_v12 }
 0x44d   : > { %v1211_v13 = vpop.xlane.xlu0 %1210 }
 0x44e   : > { %v1212_v14 = vmul.f32 %v1211_v13, %v1205_v7 }
 0x450   : > { %v1213_v15 = vadd.f32 1e-05, %v1212_v14 }
 0x452   : > { %1601 = vrsqrt.f32 %v1213_v15  ;;  %vm1220_vm7 = vweird.f32 %v1213_v15 }
 0x458   : > { %v1602_v16 = vpop.eup %1601 }
 0x459   : > { %v1215_v17 = vmul.f32 %v1602_v16, %v1213_v15  ;;  %vm1221_vm6 = vweird.f32 %v1602_v16 }
 0x45a   : > { %vm1222_vm8 = vmor %vm1220_vm7, %vm1221_vm6 }
 0x45b   : > { %v1216_v18 = vmul.f32 %v1602_v16, %v1215_v17 }
 0x45d   : > { %v1217_v19 = vmul.f32 0.5, %v1216_v18 }
 0x45f   : > { %v1218_v20 = vsub.f32 1.5, %v1217_v19 }
 0x461   : > { %v1219_v21 = vmul.f32 %v1602_v16, %v1218_v20 }
 0x463   : > { %v1223_v23 = vsel %vm1222_vm8, %v1602_v16, %v1219_v21 }
 0x464   : > { %v1224_v24 = vmul.f32 %v1223_v23, %v1207_v10 }
 0x466   : > { %v1229_v26 = vmul.f32 %v1581_v22, %v1224_v24 }
 0x468   : > { %v1234_v27 = vadd.f32 %v1582_v25, %v1229_v26 }
 0x46a   : > { %1235 = vst.msk [vmem:[%s439_s18] sm:$0xff] %vm500_vm0, %v1234_v27 }
 0x46b   : > { %1630 = shalt.err (!%p1627_p5)
}
 0x46c   : > { %1512 = dma.vmem_to_hbm [thread:$0]  (%p1789_p4), %s1251_s24, 128, %s1253_s20, %s1237_s27  }
 0x46d PF: > { %s2075_s19 = sld [smem:[#allocation5_spill]]  ;;  %p1518_p6 = scmp.ge.s32.totalorder %s1681_s26, 2 }
 0x46f   : > { %p1515_p7 = pnand %p1518_p6, %p1796_p8 }
 0x471   : > { %p1516_p9 = pneg %p1515_p7 }
 0x473   : > { %s1264_s17 = sand.u32 1, %s2075_s19  }
 0x474   : > { %s1265_s25 = scalar_lea.sflag [#allocation3], %s1264_s17 }
 0x475   : > { %1656 = dma.done.wait (%p1516_p9), %s1265_s25, 128  }
 0x476   : > { %1658 = vsyncadd (%p1516_p9), %s1265_s25, 4294967168  ;;  %s25_s26 = sadd.s32 1, %s1681_s26   ;;  %s2077_s18 = sld [smem:[#allocation6_spill]] }
 0x477   : > { %p22_p10 = scmp.ge.s32.totalorder %s25_s26, 4   ;;  %s2078_s23 = sld [smem:[#allocation10_spill]] }
 0x478   : > { %s2079_s24 = sld [smem:[#allocation7_spill]]  ;;  %s2081_s21 = smov %s1665_s22 }
 0x479   : > { %s2080_s25 = sld [smem:[#allocation8_spill]]  ;;  %24 = sbr.rel (!%p22_p10) target bundleno = 4 (0x4), region = 106 }
 0x47c   : > { %s2082_s22 = smov %s2077_s18 }
 0x47e   :  { %1271 = vsyncpa [#allocation3], 1 }
 0x47f   :  { %1273 = vsyncpa [#allocation3 + $0x1], 1 }

</bundles_post_ra>
